<compile_context>
chip_gen: v7x
topology: tpu7x:2x2x1
jax: 0.10.0
libtpu: 0.0.40
codegen_flags: <defaults>
</compile_context>

<pallas_src>
import jax
import jax.numpy as jnp
from jax import lax
from jax.experimental import pallas as pl
from jax.experimental.pallas import tpu as pltpu

_LANE = 128
_SUBLANE = 8


def _round_up(x, m):
    return ((x + m - 1) // m) * m


def _vmem_limit_bytes():
    # Generation-aware scoped-VMEM limit (v5e/v6e: 128 MiB physical, v7x: 64 MiB).
    try:
        cap = pltpu.get_tpu_info().vmem_capacity_bytes
    except Exception:
        cap = 64 * 1024 * 1024
    return min(int(cap * 3 // 4), 100 * 1024 * 1024)


def gru_kernel(maxlen_ref, len_ref, states_ref, gitbl_ref, whh_ref, bih_ref,
               bhh_ref, wfc_ref, bfc_ref, out_ref, gi_ref, h_ref):
    """One (batch tile i, item tile j) grid point.

    maxlen_ref : [nb]          int32 SMEM (scalar prefetch) per-tile max length
    len_ref    : [Bt, 1]       int32 sequence lengths (padded rows = 0)
    states_ref : [T*Bt, 1]     int32 token ids, time-major within the tile
    gitbl_ref  : [Vp, 3*Hp]    bf16  E @ W_ih^T, gate g at cols [g*Hp, g*Hp+H)
    whh_ref    : [Hp, 3*Hp]    bf16  hidden weights, same lane-aligned gate layout
    bih_ref    : [1, 3*Hp]     f32
    bhh_ref    : [1, 3*Hp]     f32
    wfc_ref    : [Hp, TILE_I]  bf16  final-FC column tile
    bfc_ref    : [1, TILE_I]   f32
    out_ref    : [Bt, TILE_I]  f32
    gi_ref     : [T, Bt, 3*Hp] f32 VMEM scratch (hoisted input projection)
    h_ref      : [Bt, Hp]      f32 VMEM scratch (final hidden, persists over j)
    """
    T, Bt, _ = gi_ref.shape
    Hp = h_ref.shape[1]
    Vp = gitbl_ref.shape[0]
    i = pl.program_id(0)
    j = pl.program_id(1)

    @pl.when(j == 0)
    def _():
        # ---- Fused embedding lookup + input projection (one one-hot MXU matmul):
        #      gi[t, b] = (E @ W_ih^T)[states[t, b]] + b_ih.  No emb HBM round-trip.
        # TODO(synk): for very large item vocabularies (table won't fit VMEM) replace
        # the one-hot matmul with a manual DMA row gather from HBM.
        st = states_ref[...]                                     # [T*Bt, 1] int32
        vids = lax.broadcasted_iota(jnp.int32, (T * Bt, Vp), 1)
        onehot = jnp.where(vids == st, 1.0, 0.0).astype(jnp.bfloat16)
        gi = jnp.dot(onehot, gitbl_ref[...],
                     preferred_element_type=jnp.float32) + bih_ref[...]
        gi_ref[...] = gi.reshape(T, Bt, 3 * Hp)

        # ---- Serial GRU recurrence: only h_prev @ W_hh remains on the T-long path.
        b_hh = bhh_ref[...]                                      # loop-invariant
        len_bcast = jnp.broadcast_to(len_ref[...], (Bt, Hp))     # [Bt, Hp] int32

        def step(t, h_prev):
            gi_t = gi_ref[t]                                     # [Bt, 3*Hp]
            gh = jnp.dot(h_prev.astype(jnp.bfloat16), whh_ref[...],
                         preferred_element_type=jnp.float32) + b_hh
            r = jax.nn.sigmoid(gi_t[:, :Hp] + gh[:, :Hp])
            z = jax.nn.sigmoid(gi_t[:, Hp:2 * Hp] + gh[:, Hp:2 * Hp])
            n = jnp.tanh(gi_t[:, 2 * Hp:] + r * gh[:, 2 * Hp:])
            h_new = n + z * (h_prev - n)
            # Packed-sequence semantics: hidden freezes once t >= len[b].
            return jnp.where(t < len_bcast, h_new, h_prev)

        h0 = jnp.zeros((Bt, Hp), jnp.float32)
        # Data-dependent bound: padded timesteps beyond the tile's longest sequence
        # are skipped entirely (loop bound read from SMEM scalar prefetch).
        h_ref[...] = lax.fori_loop(0, maxlen_ref[i], step, h0)

    # ---- Final linear, streamed over lane-dense item tiles.
    out_ref[...] = (jnp.dot(h_ref[...].astype(jnp.bfloat16), wfc_ref[...],
                            preferred_element_type=jnp.float32) + bfc_ref[...])


def prepare_params(params):
    """One-time weight prep: fold E@W_ih^T, pad/transpose, lane-align gates, cast bf16."""
    H = params["emb"].shape[1]
    V = params["emb"].shape[0]                       # item_num + 1
    item_num = params["w_fc"].shape[0]
    Hp = _round_up(H, _LANE)
    Vp = _round_up(V, _LANE)
    Ip0 = _round_up(item_num, _LANE)
    tile_i = Ip0 if Ip0 <= 2048 else 2048            # FC streamed in <=2048-lane tiles
    Ip = _round_up(Ip0, tile_i)

    emb = params["emb"].astype(jnp.float32)
    w_ih = params["w_ih"].astype(jnp.float32)        # [3H, H], gates ordered (r, z, n)

    # Fold embedding lookup + input projection: gi_row[v] = E[v] @ W_ih^T  (f32 precompute).
    gi_full = emb @ w_ih.T                           # [V, 3H]
    gi_tbl = jnp.zeros((Vp, 3 * Hp), jnp.float32)
    for g in range(3):
        gi_tbl = gi_tbl.at[:V, g * Hp:g * Hp + H].set(gi_full[:, g * H:(g + 1) * H])

    def gate_weight(w):          # PyTorch layout [3H, H]
        wt = w.T.astype(jnp.float32)                 # [H, 3H]
        out = jnp.zeros((Hp, 3 * Hp), jnp.float32)
        for g in range(3):
            out = out.at[:H, g * Hp:g * Hp + H].set(wt[:, g * H:(g + 1) * H])
        return out

    def gate_bias(b):            # [3H]
        b = b.astype(jnp.float32)
        out = jnp.zeros((1, 3 * Hp), jnp.float32)
        for g in range(3):
            out = out.at[0, g * Hp:g * Hp + H].set(b[g * H:(g + 1) * H])
        return out

    wfc = jnp.zeros((Hp, Ip), jnp.float32)
    wfc = wfc.at[:H, :item_num].set(params["w_fc"].T.astype(jnp.float32))
    bfc = jnp.zeros((1, Ip), jnp.float32)
    bfc = bfc.at[0, :item_num].set(params["b_fc"].astype(jnp.float32))

    # TODO(synk): for H far below 128, pack all 3 gates into one 128-lane block
    # (XLU gate split) instead of per-gate lane padding, to avoid (Hp/H)^2 MXU waste.
    return {
        "gi_table": gi_tbl.astype(jnp.bfloat16),
        "w_hh": gate_weight(params["w_hh"]).astype(jnp.bfloat16),
        "b_ih": gate_bias(params["b_ih"]),
        "b_hh": gate_bias(params["b_hh"]),
        "w_fc": wfc.astype(jnp.bfloat16),
        "b_fc": bfc,
        "H": H, "Hp": Hp, "Vp": Vp,
        "item_num": item_num, "Ip": Ip, "tile_i": tile_i,
    }


def gru_forward(states, len_states, prepped):
    """states: [B, T] int32, len_states: [B] int32 -> logits [B, item_num]."""
    B, T = states.shape
    Hp, Vp = prepped["Hp"], prepped["Vp"]
    Ip, tile_i = prepped["Ip"], prepped["tile_i"]
    item_num = prepped["item_num"]

    # Batch tiling: Bt == Bp (single tile) or a multiple of 128 keeps every block
    # lane-legal; 256-row tiles fill the 256-wide MXU M dim on v6e/v7x, and >=2
    # programs on larger batches keep both v7x TensorCores busy.
    B8 = _round_up(B, _SUBLANE)
    if B8 <= 128:
        Bt = B8
    elif B8 <= 512:
        Bt = 128
    else:
        Bt = 256
    Bp = _round_up(B, Bt)
    nb = Bp // Bt
    ni = Ip // tile_i

    states_p = jnp.zeros((Bp, T), jnp.int32).at[:B, :].set(states.astype(jnp.int32))
    len_p = jnp.zeros((Bp, 1), jnp.int32).at[:B, 0].set(len_states.astype(jnp.int32))
    # Per-tile loop bound, scalar-prefetched to SMEM.
    max_len = jnp.max(len_p.reshape(nb, Bt), axis=1).astype(jnp.int32)
    # Token ids rearranged so each batch tile's (t, b) rows form one contiguous
    # time-major [T*Bt, 1] column -> no in-kernel lane<->sublane relayout.
    states_col = (states_p.T.reshape(T, nb, Bt).transpose(1, 0, 2)
                  .reshape(nb * T * Bt, 1))

    # TODO(synk): single-buffer the constant weight operands (pipeline_mode=pl.Buffered(1))
    # once validated on the target jax version; bf16 already halves their footprint.
    out = pl.pallas_call(
        gru_kernel,
        out_shape=jax.ShapeDtypeStruct((Bp, Ip), jnp.float32),
        grid_spec=pltpu.PrefetchScalarGridSpec(
            num_scalar_prefetch=1,
            grid=(nb, ni),
            in_specs=[
                pl.BlockSpec((Bt, 1), lambda i, j, ml: (i, 0)),          # lengths
                pl.BlockSpec((T * Bt, 1), lambda i, j, ml: (i, 0)),      # token ids
                pl.BlockSpec((Vp, 3 * Hp), lambda i, j, ml: (0, 0)),     # E @ W_ih^T
                pl.BlockSpec((Hp, 3 * Hp), lambda i, j, ml: (0, 0)),     # w_hh
                pl.BlockSpec((1, 3 * Hp), lambda i, j, ml: (0, 0)),      # b_ih
                pl.BlockSpec((1, 3 * Hp), lambda i, j, ml: (0, 0)),      # b_hh
                pl.BlockSpec((Hp, tile_i), lambda i, j, ml: (0, j)),     # w_fc tile
                pl.BlockSpec((1, tile_i), lambda i, j, ml: (0, j)),      # b_fc tile
            ],
            out_specs=pl.BlockSpec((Bt, tile_i), lambda i, j, ml: (i, j)),
            scratch_shapes=[pltpu.VMEM((T, Bt, 3 * Hp), jnp.float32),    # hoisted gi
                            pltpu.VMEM((Bt, Hp), jnp.float32)],          # final hidden
        ),
        compiler_params=pltpu.CompilerParams(
            dimension_semantics=("parallel", "arbitrary"),
            vmem_limit_bytes=_vmem_limit_bytes(),
        ),
    )(max_len, len_p, states_col, prepped["gi_table"], prepped["w_hh"],
      prepped["b_ih"], prepped["b_hh"], prepped["w_fc"], prepped["b_fc"])

    return out[:B, :item_num]


def gru_reference(states, len_states, params):
    """Pure-JAX f32 reference matching PyTorch GRU + packed-sequence final hidden."""
    H = params["emb"].shape[1]
    emb = jnp.take(params["emb"], states, axis=0)              # [B, T, H]
    B, T, _ = emb.shape
    wih_t = params["w_ih"].T
    whh_t = params["w_hh"].T
    b_ih = params["b_ih"]
    b_hh = params["b_hh"]

    def step(h, inp):
        x_t, t = inp
        gi = x_t @ wih_t + b_ih
        gh = h @ whh_t + b_hh
        i_r, i_z, i_n = gi[:, :H], gi[:, H:2 * H], gi[:, 2 * H:]
        h_r, h_z, h_n = gh[:, :H], gh[:, H:2 * H], gh[:, 2 * H:]
        r = jax.nn.sigmoid(i_r + h_r)
        z = jax.nn.sigmoid(i_z + h_z)
        n = jnp.tanh(i_n + r * h_n)
        h_new = (1.0 - z) * n + z * h
        valid = (t < len_states)[:, None]
        h = jnp.where(valid, h_new, h)
        return h, None

    h0 = jnp.zeros((B, H), jnp.float32)
    xs = (jnp.transpose(emb, (1, 0, 2)), jnp.arange(T))
    h_final, _ = lax.scan(step, h0, xs)
    return h_final @ params["w_fc"].T + params["b_fc"]


def init_params(key, hidden_size, item_num):
    k = 1.0 / jnp.sqrt(hidden_size)
    keys = jax.random.split(key, 7)
    return {
        "emb": 0.01 * jax.random.normal(keys[0], (item_num + 1, hidden_size), jnp.float32),
        "w_ih": jax.random.uniform(keys[1], (3 * hidden_size, hidden_size), jnp.float32, -k, k),
        "w_hh": jax.random.uniform(keys[2], (3 * hidden_size, hidden_size), jnp.float32, -k, k),
        "b_ih": jax.random.uniform(keys[3], (3 * hidden_size,), jnp.float32, -k, k),
        "b_hh": jax.random.uniform(keys[4], (3 * hidden_size,), jnp.float32, -k, k),
        "w_fc": jax.random.uniform(keys[5], (item_num, hidden_size), jnp.float32, -k, k),
        "b_fc": jax.random.uniform(keys[6], (item_num,), jnp.float32, -k, k),
    }


if __name__ == "__main__":
    B, T, H, ITEM_NUM = 2, 8, 32, 40
    key = jax.random.PRNGKey(0)
    k_param, k_states = jax.random.split(key)

    params = init_params(k_param, H, ITEM_NUM)
    prepped = prepare_params(params)            # one-time weight prep (not per call)

    states = jax.random.randint(k_states, (B, T), 1, ITEM_NUM + 1, dtype=jnp.int32)
    len_states = jnp.array([T, 5], dtype=jnp.int32)            # variable-length sequences

    logits = gru_forward(states, len_states, prepped)
    logits = jax.block_until_ready(logits)

    ref = gru_reference(states, len_states, params)
    assert logits.shape == (B, ITEM_NUM)
    # bf16 matmul operands (f32 accumulation) -> looser tolerance vs the f32 reference.
    assert jnp.allclose(logits, ref, rtol=2e-2, atol=2e-2), "mismatch vs JAX reference"

    print("KERNEL_OK")
</pallas_src>

<mosaic_0001>
module attributes {stable_mosaic.version = 11 : i64} {
  func.func @gru_kernel(%arg0: i32, %arg1: i32, %arg2: memref<1xi32, #tpu.memory_space<smem>>, %arg3: memref<8x1xi32, #tpu.memory_space<vmem>>, %arg4: memref<64x1xi32, #tpu.memory_space<vmem>>, %arg5: memref<128x384xbf16, #tpu.memory_space<vmem>>, %arg6: memref<128x384xbf16, #tpu.memory_space<vmem>>, %arg7: memref<1x384xf32, #tpu.memory_space<vmem>>, %arg8: memref<1x384xf32, #tpu.memory_space<vmem>>, %arg9: memref<128x128xbf16, #tpu.memory_space<vmem>>, %arg10: memref<1x128xf32, #tpu.memory_space<vmem>>, %arg11: memref<8x128xf32, #tpu.memory_space<vmem>>, %arg12: memref<8x8x384xf32, #tpu.memory_space<vmem>>, %arg13: memref<8x128xf32, #tpu.memory_space<vmem>>) attributes {dimension_semantics = [#tpu.dimension_semantics<parallel>, #tpu.dimension_semantics<arbitrary>], iteration_bounds = array<i64: 1, 1>, scalar_prefetch = 1 : i64, scratch_operands = 2 : i64, tpu.core_type = #tpu.core_type<tc>, window_params = [{transform_indices = @transform_0, window_bounds = array<i64: 8, 1>}, {transform_indices = @transform_1, window_bounds = array<i64: 64, 1>}, {pipeline_mode = #tpu.pipeline_mode<synchronous>, transform_indices = @transform_2, window_bounds = array<i64: 128, 384>}, {pipeline_mode = #tpu.pipeline_mode<synchronous>, transform_indices = @transform_3, window_bounds = array<i64: 128, 384>}, {pipeline_mode = #tpu.pipeline_mode<synchronous>, transform_indices = @transform_4, window_bounds = array<i64: 1, 384>}, {pipeline_mode = #tpu.pipeline_mode<synchronous>, transform_indices = @transform_5, window_bounds = array<i64: 1, 384>}, {transform_indices = @transform_6, window_bounds = array<i64: 128, 128>}, {transform_indices = @transform_7, window_bounds = array<i64: 1, 128>}, {transform_indices = @transform_8, window_bounds = array<i64: 8, 128>}]} {
    %c0_i32 = arith.constant 0 : i32
    %0 = arith.cmpi eq, %arg1, %c0_i32 : i32
    %1 = arith.extui %0 : i1 to i32
    %c0_i32_0 = arith.constant 0 : i32
    %2 = arith.cmpi ne, %1, %c0_i32_0 : i32
    scf.if %2 {
      %c0_8 = arith.constant 0 : index
      %c0_9 = arith.constant 0 : index
      %11 = vector.load %arg4[%c0_8, %c0_9] : memref<64x1xi32, #tpu.memory_space<vmem>>, vector<64x1xi32>
      %12 = tpu.iota {dimensions = array<i32: 1>} : vector<64x128xi32>
      %13 = vector.broadcast %11 : vector<64x1xi32> to vector<64x128xi32>
      %14 = arith.cmpi eq, %12, %13 : vector<64x128xi32>
      %cst_10 = arith.constant 1.000000e+00 : f32
      %cst_11 = arith.constant 0.000000e+00 : f32
      %15 = vector.broadcast %cst_10 : f32 to vector<64x128xf32>
      %16 = vector.broadcast %cst_11 : f32 to vector<64x128xf32>
      %17 = arith.select %14, %15, %16 : vector<64x128xi1>, vector<64x128xf32>
      %18 = arith.truncf %17 : vector<64x128xf32> to vector<64x128xbf16>
      %c0_12 = arith.constant 0 : index
      %c0_13 = arith.constant 0 : index
      %19 = vector.load %arg5[%c0_12, %c0_13] : memref<128x384xbf16, #tpu.memory_space<vmem>>, vector<128x384xbf16>
      %cst_14 = arith.constant dense<0.000000e+00> : vector<64x384xf32>
      %20 = tpu.matmul %18, %19, %cst_14 {dimension_numbers = #tpu.dot_dimension_numbers<[1], [0], [0], [1], [0, 0, 1, 1], [], []>} : vector<64x128xbf16>, vector<128x384xbf16>, vector<64x384xf32> -> vector<64x384xf32>
      %c0_15 = arith.constant 0 : index
      %c0_16 = arith.constant 0 : index
      %21 = vector.load %arg7[%c0_15, %c0_16] : memref<1x384xf32, #tpu.memory_space<vmem>>, vector<1x384xf32>
      %22 = vector.broadcast %21 : vector<1x384xf32> to vector<64x384xf32>
      %23 = arith.addf %20, %22 : vector<64x384xf32>
      %24 = vector.shape_cast %23 : vector<64x384xf32> to vector<8x8x384xf32>
      %c0_17 = arith.constant 0 : index
      %c0_18 = arith.constant 0 : index
      %c0_19 = arith.constant 0 : index
      %25 = vector.load %arg12[%c0_17, %c0_18, %c0_19] : memref<8x8x384xf32, #tpu.memory_space<vmem>>, vector<8x8x384xf32>
      tpu.vector_store %arg12[%c0_17, %c0_18, %c0_19], %24 {strides = array<i32>} : memref<8x8x384xf32, #tpu.memory_space<vmem>>, vector<8x8x384xf32>,
      %c0_20 = arith.constant 0 : index
      %c0_21 = arith.constant 0 : index
      %26 = vector.load %arg8[%c0_20, %c0_21] : memref<1x384xf32, #tpu.memory_space<vmem>>, vector<1x384xf32>
      %c0_22 = arith.constant 0 : index
      %c0_23 = arith.constant 0 : index
      %27 = vector.load %arg3[%c0_22, %c0_23] : memref<8x1xi32, #tpu.memory_space<vmem>>, vector<8x1xi32>
      %28 = vector.shape_cast %27 : vector<8x1xi32> to vector<8x1xi32>
      %29 = vector.broadcast %28 : vector<8x1xi32> to vector<8x128xi32>
      %cst_24 = arith.constant 0.000000e+00 : f32
      %30 = vector.broadcast %cst_24 : f32 to vector<8x128xf32>
      %31 = arith.index_cast %arg0 : i32 to index
      %32 = memref.load %arg2[%31] : memref<1xi32, #tpu.memory_space<smem>>
      %c0_i32_25 = arith.constant 0 : i32
      %33 = arith.subi %32, %c0_i32_25 : i32
      %34 = arith.addi %c0_i32_25, %33 : i32
      %c1_i32 = arith.constant 1 : i32
      %35 = scf.for %arg14 = %c0_i32_25 to %34 step %c1_i32 iter_args(%arg15 = %30) -> (vector<8x128xf32>)  : i32 {
        %37 = arith.index_cast %arg14 : i32 to index
        %c0_28 = arith.constant 0 : index
        %c0_29 = arith.constant 0 : index
        %38 = vector.load %arg12[%37, %c0_28, %c0_29] : memref<8x8x384xf32, #tpu.memory_space<vmem>>, vector<1x8x384xf32>
        %39 = vector.shape_cast %38 : vector<1x8x384xf32> to vector<8x384xf32>
        %40 = arith.truncf %arg15 : vector<8x128xf32> to vector<8x128xbf16>
        %c0_30 = arith.constant 0 : index
        %c0_31 = arith.constant 0 : index
        %41 = vector.load %arg6[%c0_30, %c0_31] : memref<128x384xbf16, #tpu.memory_space<vmem>>, vector<128x384xbf16>
        %cst_32 = arith.constant dense<0.000000e+00> : vector<8x384xf32>
        %42 = tpu.matmul %40, %41, %cst_32 {dimension_numbers = #tpu.dot_dimension_numbers<[1], [0], [0], [1], [0, 0, 1, 1], [], []>} : vector<8x128xbf16>, vector<128x384xbf16>, vector<8x384xf32> -> vector<8x384xf32>
        %43 = vector.broadcast %26 : vector<1x384xf32> to vector<8x384xf32>
        %44 = arith.addf %42, %43 : vector<8x384xf32>
        %45 = vector.extract_strided_slice %39 {offsets = [0, 0], sizes = [8, 128], strides = [1, 1]} : vector<8x384xf32> to vector<8x128xf32>
        %46 = vector.extract_strided_slice %44 {offsets = [0, 0], sizes = [8, 128], strides = [1, 1]} : vector<8x384xf32> to vector<8x128xf32>
        %47 = arith.addf %45, %46 : vector<8x128xf32>
        %48 = arith.negf %47 : vector<8x128xf32>
        %49 = math.exp %48 : vector<8x128xf32>
        %cst_33 = arith.constant 1.000000e+00 : f32
        %50 = vector.broadcast %cst_33 : f32 to vector<8x128xf32>
        %51 = arith.addf %50, %49 : vector<8x128xf32>
        %52 = arith.divf %50, %51 : vector<8x128xf32>
        %53 = vector.extract_strided_slice %39 {offsets = [0, 128], sizes = [8, 128], strides = [1, 1]} : vector<8x384xf32> to vector<8x128xf32>
        %54 = vector.extract_strided_slice %44 {offsets = [0, 128], sizes = [8, 128], strides = [1, 1]} : vector<8x384xf32> to vector<8x128xf32>
        %55 = arith.addf %53, %54 : vector<8x128xf32>
        %56 = arith.negf %55 : vector<8x128xf32>
        %57 = math.exp %56 : vector<8x128xf32>
        %cst_34 = arith.constant 1.000000e+00 : f32
        %58 = vector.broadcast %cst_34 : f32 to vector<8x128xf32>
        %59 = arith.addf %58, %57 : vector<8x128xf32>
        %60 = arith.divf %58, %59 : vector<8x128xf32>
        %61 = vector.extract_strided_slice %39 {offsets = [0, 256], sizes = [8, 128], strides = [1, 1]} : vector<8x384xf32> to vector<8x128xf32>
        %62 = vector.extract_strided_slice %44 {offsets = [0, 256], sizes = [8, 128], strides = [1, 1]} : vector<8x384xf32> to vector<8x128xf32>
        %63 = arith.mulf %52, %62 : vector<8x128xf32>
        %64 = arith.addf %61, %63 : vector<8x128xf32>
        %65 = math.tanh %64 : vector<8x128xf32>
        %66 = arith.subf %arg15, %65 : vector<8x128xf32>
        %67 = arith.mulf %60, %66 : vector<8x128xf32>
        %68 = arith.addf %65, %67 : vector<8x128xf32>
        %69 = vector.broadcast %arg14 : i32 to vector<8x128xi32>
        %70 = arith.cmpi slt, %69, %29 : vector<8x128xi32>
        %71 = arith.select %70, %68, %arg15 : vector<8x128xi1>, vector<8x128xf32>
        scf.yield %71 : vector<8x128xf32>
      }
      %c0_26 = arith.constant 0 : index
      %c0_27 = arith.constant 0 : index
      %36 = vector.load %arg13[%c0_26, %c0_27] : memref<8x128xf32, #tpu.memory_space<vmem>>, vector<8x128xf32>
      tpu.vector_store %arg13[%c0_26, %c0_27], %35 {strides = array<i32>} : memref<8x128xf32, #tpu.memory_space<vmem>>, vector<8x128xf32>,
    } else {
    }
    %c0 = arith.constant 0 : index
    %c0_1 = arith.constant 0 : index
    %3 = vector.load %arg13[%c0, %c0_1] : memref<8x128xf32, #tpu.memory_space<vmem>>, vector<8x128xf32>
    %4 = arith.truncf %3 : vector<8x128xf32> to vector<8x128xbf16>
    %c0_2 = arith.constant 0 : index
    %c0_3 = arith.constant 0 : index
    %5 = vector.load %arg9[%c0_2, %c0_3] : memref<128x128xbf16, #tpu.memory_space<vmem>>, vector<128x128xbf16>
    %cst = arith.constant dense<0.000000e+00> : vector<8x128xf32>
    %6 = tpu.matmul %4, %5, %cst {dimension_numbers = #tpu.dot_dimension_numbers<[1], [0], [0], [1], [0, 0, 1, 1], [], []>} : vector<8x128xbf16>, vector<128x128xbf16>, vector<8x128xf32> -> vector<8x128xf32>
    %c0_4 = arith.constant 0 : index
    %c0_5 = arith.constant 0 : index
    %7 = vector.load %arg10[%c0_4, %c0_5] : memref<1x128xf32, #tpu.memory_space<vmem>>, vector<1x128xf32>
    %8 = vector.broadcast %7 : vector<1x128xf32> to vector<8x128xf32>
    %9 = arith.addf %6, %8 : vector<8x128xf32>
    %c0_6 = arith.constant 0 : index
    %c0_7 = arith.constant 0 : index
    %10 = vector.load %arg11[%c0_6, %c0_7] : memref<8x128xf32, #tpu.memory_space<vmem>>, vector<8x128xf32>
    tpu.vector_store %arg11[%c0_6, %c0_7], %9 {strides = array<i32>} : memref<8x128xf32, #tpu.memory_space<vmem>>, vector<8x128xf32>,
    return
  }
  func.func @transform_0(%arg0: i32, %arg1: i32, %arg2: memref<1xi32, #tpu.memory_space<smem>>) -> (i32, i32) {
    %c0_i32 = arith.constant 0 : i32
    %c0_i32_0 = arith.constant 0 : i32
    return %arg0, %c0_i32 : i32, i32
  }
  func.func @transform_1(%arg0: i32, %arg1: i32, %arg2: memref<1xi32, #tpu.memory_space<smem>>) -> (i32, i32) {
    %c0_i32 = arith.constant 0 : i32
    %c0_i32_0 = arith.constant 0 : i32
    return %arg0, %c0_i32 : i32, i32
  }
  func.func @transform_2(%arg0: i32, %arg1: i32, %arg2: memref<1xi32, #tpu.memory_space<smem>>) -> (i32, i32) {
    %c0_i32 = arith.constant 0 : i32
    %c0_i32_0 = arith.constant 0 : i32
    %c0_i32_1 = arith.constant 0 : i32
    return %c0_i32, %c0_i32_0 : i32, i32
  }
  func.func @transform_3(%arg0: i32, %arg1: i32, %arg2: memref<1xi32, #tpu.memory_space<smem>>) -> (i32, i32) {
    %c0_i32 = arith.constant 0 : i32
    %c0_i32_0 = arith.constant 0 : i32
    %c0_i32_1 = arith.constant 0 : i32
    return %c0_i32, %c0_i32_0 : i32, i32
  }
  func.func @transform_4(%arg0: i32, %arg1: i32, %arg2: memref<1xi32, #tpu.memory_space<smem>>) -> (i32, i32) {
    %c0_i32 = arith.constant 0 : i32
    %c0_i32_0 = arith.constant 0 : i32
    %c0_i32_1 = arith.constant 0 : i32
    return %c0_i32, %c0_i32_0 : i32, i32
  }
  func.func @transform_5(%arg0: i32, %arg1: i32, %arg2: memref<1xi32, #tpu.memory_space<smem>>) -> (i32, i32) {
    %c0_i32 = arith.constant 0 : i32
    %c0_i32_0 = arith.constant 0 : i32
    %c0_i32_1 = arith.constant 0 : i32
    return %c0_i32, %c0_i32_0 : i32, i32
  }
  func.func @transform_6(%arg0: i32, %arg1: i32, %arg2: memref<1xi32, #tpu.memory_space<smem>>) -> (i32, i32) {
    %c0_i32 = arith.constant 0 : i32
    %c0_i32_0 = arith.constant 0 : i32
    return %c0_i32, %arg1 : i32, i32
  }
  func.func @transform_7(%arg0: i32, %arg1: i32, %arg2: memref<1xi32, #tpu.memory_space<smem>>) -> (i32, i32) {
    %c0_i32 = arith.constant 0 : i32
    %c0_i32_0 = arith.constant 0 : i32
    return %c0_i32, %arg1 : i32, i32
  }
  func.func @transform_8(%arg0: i32, %arg1: i32, %arg2: memref<1xi32, #tpu.memory_space<smem>>) -> (i32, i32) {
    %c0_i32 = arith.constant 0 : i32
    return %arg0, %arg1 : i32, i32
  }
}

</mosaic_0001>

<bundles_post_ra>
// kernel: tpu_custom_call.1
= control target key start
LH: loop header
LB: loop body
LE: loop exit
PB: predicated region body
PF: predicated region fallthrough
CT: control target
= control target key end

     0   :  { %15 = vsyncpa [#allocation7], 0  ;;  %s1536_s0 = inlined_call_operand.<no memory space> [shape: s32[1], index: 0, kind: input, shape index: {}]   ;;  %s1537_s1 = inlined_call_operand.vmem [shape: s32[8,1], index: 1, kind: input, shape index: {}]   ;;  %s1538_s2 = inlined_call_operand.vmem [shape: s32[64,1], index: 2, kind: input, shape index: {}]   ;;  %s1539_s3 = inlined_call_operand.hbm [shape: bf16[128,384], index: 3, kind: input, shape index: {}]   ;;  %s1540_s4 = inlined_call_operand.hbm [shape: bf16[128,384], index: 4, kind: input, shape index: {}]   ;;  %s1541_s5 = inlined_call_operand.vmem [shape: f32[1,384], index: 5, kind: input, shape index: {}]   ;;  %s1542_s6 = inlined_call_operand.vmem [shape: f32[1,384], index: 6, kind: input, shape index: {}]   ;;  %s1543_s7 = inlined_call_operand.vmem [shape: bf16[128,128], index: 7, kind: input, shape index: {}]   ;;  %s1544_s8 = inlined_call_operand.vmem [shape: f32[1,128], index: 8, kind: input, shape index: {}]   ;;  %s1545_s9 = inlined_call_operand.hbm [shape: f32[8,128], index: 9, kind: output, shape index: {}]  }
   0x1   :  { %16 = vsyncpa [#allocation10], 0 }
   0x2   :  { %17 = vsyncpa [#allocation8], 0  ;;  %s1287_s30 = smov [#allocation6]   ;;  %s1191_s13 = scalar_lea.hbm %s1539_s3, 3072 }
   0x3   :  { %s27_s10 = sshll.u32 %s1287_s30, 4  ;;  %p1192_p0 = scmp.ne.s32.totalorder %s1539_s3, %s1191_s13  ;;  %s28_s10 = int_to_ptr.vmem [resolvable:$true] %s27_s10 }
   0x4   :  { %p1195_p1 = scmp.lt.u32.totalorder %s1191_s13, %s1539_s3 }
   0x6   :  { %p1197_p2 = pnand %p1195_p1, %p1192_p0 }
   0x8   :  { %1200 = shalt.err (!%p1197_p2)
}
   0x9   :  { %s1201_s18 = scalar_lea.vmem %s28_s10, 3072  ;;  %p1206_p4 = scmp.lt.s32.totalorder %s28_s10, %s28_s10 }
   0xa   :  { %p1202_p3 = scmp.ne.s32.totalorder %s28_s10, %s1201_s18  ;;  %p1207_p5 = scmp.lt.s32.totalorder %s1201_s18, %s1201_s18 }
   0xc   :  { %p1208_p6 = por %p1207_p5, %p1206_p4 }
   0xe   :  { %p1209_p7 = pnand %p1208_p6, %p1202_p3 }
  0x10   :  { %1212 = shalt.err (!%p1209_p7)
}
  0x11   :  { %s1288_s19 = smov 192   ;;  %s1289_s20 = smov 12  }
  0x12   :  { %33 = dma.hbm_to_vmem [thread:$0]  %s1539_s3, 3072, %s28_s10, [#allocation7], %s1288_s19, %s1288_s19, %s1289_s20  }
  0x13   :  { %s1290_s23 = smov [#allocation9]   ;;  %s1213_s27 = scalar_lea.hbm %s1540_s4, 3072 }
  0x14   :  { %s39_s24 = sshll.u32 %s1290_s23, 4  ;;  %p1214_p8 = scmp.ne.s32.totalorder %s1540_s4, %s1213_s27  ;;  %s40_s24 = int_to_ptr.vmem [resolvable:$true] %s39_s24 }
  0x15   :  { %p1217_p9 = scmp.lt.u32.totalorder %s1213_s27, %s1540_s4 }
  0x17   :  { %p1219_p10 = pnand %p1217_p9, %p1214_p8 }
  0x19   :  { %1222 = shalt.err (!%p1219_p10)
}
  0x1a   :  { %s1223_s12 = scalar_lea.vmem %s40_s24, 3072  ;;  %p1228_p12 = scmp.lt.s32.totalorder %s40_s24, %s40_s24 }
  0x1b   :  { %p1224_p11 = scmp.ne.s32.totalorder %s40_s24, %s1223_s12  ;;  %p1229_p13 = scmp.lt.s32.totalorder %s1223_s12, %s1223_s12 }
  0x1d   :  { %p1230_p0 = por %p1229_p13, %p1228_p12 }
  0x1f   :  { %p1231_p1 = pnand %p1230_p0, %p1224_p11 }
  0x21   :  { %1234 = shalt.err (!%p1231_p1)
}
  0x22   :  { %45 = dma.hbm_to_vmem [thread:$0]  %s1540_s4, 3072, %s40_s24, [#allocation10], %s1288_s19, %s1288_s19, %s1289_s20  }
  0x23   :  { %1269 = dma.done.wait [#allocation7], 3072  }
  0x24   :  { %1270 = vsyncadd [#allocation7], 4294964224 }
  0x25   :  { %1271 = dma.done.wait [#allocation10], 3072  }
  0x26   :  { %1272 = vsyncadd [#allocation10], 4294964224  ;;  %v1291_v0 = vmov 0   ;;  %v1379_v1 = vld [vmem:[%s1542_s6] sm:$0x7]  ;;  %v67_v2 = vld [vmem:[%s1538_s2 + $0x10] sm:$0xff]  ;;  %v73_v35 = vlaneseq }
  0x27   :  { %1108 = vset.pattern.permute.xlu1 %v1291_v0  ;;  %1107 = vset.pattern.permute.xlu0 %v1291_v0  ;;  %v65_v3 = vld [vmem:[%s1538_s2] sm:$0xff]  ;;  %v68_v4 = vld [vmem:[%s1538_s2 + $0x18] sm:$0xff]  ;;  %v66_v5 = vld [vmem:[%s1538_s2 + $0x8] sm:$0xff]  ;;  %v1292_v42 = vmov 1.0|1.0   ;;  %p939_p2 = scmp.le.s32.totalorder %s1536_s0, 0 }
  0x28   :  { %328 = vmatprep.mubr.bf16.mxu0 %v1291_v0  ;;  %82 = vperm.xlu1 %1108, %v67_v2   ;;  %v70_v6 = vld [vmem:[%s1538_s2 + $0x28] sm:$0xff]  ;;  %v69_v7 = vld [vmem:[%s1538_s2 + $0x20] sm:$0xff]  ;;  %v72_v14 = vld [vmem:[%s1538_s2 + $0x38] sm:$0xff]  ;;  %v74_v38 = vand.u32 127, %v73_v35  ;;  %v1421_v48 = vshrl.u32 %v73_v35, 7  ;;  %v1458_v41 = vmov 0.0  }
  0x29   :  { %76 = vperm.xlu0 %1107, %v65_v3   ;;  %v1109_v8 = vld [vmem:[#allocation6 + $0x4] ss:$12 sps:$4 sm:$0xff]   ;;  %v1111_v9 = vld [vmem:[#allocation6] ss:$12 sps:$4 sm:$0xff]   ;;  %v1112_v10 = vld [vmem:[#allocation6 + $0x8] ss:$12 sps:$4 sm:$0xff]  }
  0x2a   :  { %296 = vmatprep.subr.bf16.mxu0 %v1109_v8  ;;  %v1113_v11 = vld [vmem:[#allocation6 + $0x1c] ss:$12 sps:$4 sm:$0xff]   ;;  %v1115_v12 = vld [vmem:[#allocation6 + $0x18] ss:$12 sps:$4 sm:$0xff]   ;;  %1007 = vmatprep.subr.bf16.mxu1 %v1112_v10  ;;  %v1116_v13 = vld [vmem:[#allocation6 + $0x20] ss:$12 sps:$4 sm:$0xff]  }
  0x2b   :  { %297 = vmatpush1.bf16.msra.mxu0 %v1111_v9  ;;  %1008 = vmatpush3.bf16.msra.mxu1 %v1112_v10  ;;  %v1117_v15 = vld [vmem:[#allocation6 + $0x34] ss:$12 sps:$4 sm:$0xff]   ;;  %v1120_v17 = vld [vmem:[#allocation6 + $0x38] ss:$12 sps:$4 sm:$0xff]   ;;  %v1119_v18 = vld [vmem:[#allocation6 + $0x30] ss:$12 sps:$4 sm:$0xff]  }
  0x2c   :  { %85 = vperm.xlu1 %1108, %v68_v4   ;;  %298 = vmatprep.subr.bf16.mxu0 %v1113_v11  ;;  %v71_v16 = vld [vmem:[%s1538_s2 + $0x30] sm:$0xff]  ;;  %v1121_v19 = vld [vmem:[#allocation6 + $0x4c] ss:$12 sps:$4 sm:$0xff]   ;;  %v459_v21 = vld [vmem:[%s1537_s1] sm:$0xff]  ;;  %v155_v49 = vsub.s32 0, %v1421_v48  ;;  %v159_v51 = vsub.s32 1, %v1421_v48 }
  0x2d   :  { %79 = vperm.xlu0 %1107, %v66_v5   ;;  %1009 = vmatprep.subr.bf16.mxu1 %v1116_v13  ;;  %v1124_v20 = vld [vmem:[#allocation6 + $0x50] ss:$12 sps:$4 sm:$0xff]   ;;  %v1123_v22 = vld [vmem:[#allocation6 + $0x48] ss:$12 sps:$4 sm:$0xff]   ;;  %v1127_v25 = vld [vmem:[#allocation6 + $0x60] ss:$12 sps:$4 sm:$0xff]  }
  0x2e   :  { %v1125_v23 = vld [vmem:[#allocation6 + $0x64] ss:$12 sps:$4 sm:$0xff]   ;;  %v1128_v24 = vld [vmem:[#allocation6 + $0x68] ss:$12 sps:$4 sm:$0xff]   ;;  %v1132_v27 = vld [vmem:[#allocation6 + $0x80] ss:$12 sps:$4 sm:$0xff]  }
  0x2f   :  { %299 = vmatpush1.bf16.msra.mxu0 %v1115_v12  ;;  %1010 = vmatpush3.bf16.msra.mxu1 %v1116_v13  ;;  %v1129_v26 = vld [vmem:[#allocation6 + $0x7c] ss:$12 sps:$4 sm:$0xff]   ;;  %v1131_v28 = vld [vmem:[#allocation6 + $0x78] ss:$12 sps:$4 sm:$0xff]   ;;  %v1133_v29 = vld [vmem:[#allocation6 + $0x94] ss:$12 sps:$4 sm:$0xff]  }
  0x30   :  { %91 = vperm.xlu1 %1108, %v70_v6   ;;  %300 = vmatprep.subr.bf16.mxu0 %v1117_v15  ;;  %v1136_v30 = vld [vmem:[#allocation6 + $0x98] ss:$12 sps:$4 sm:$0xff]   ;;  %v1135_v31 = vld [vmem:[#allocation6 + $0x90] ss:$12 sps:$4 sm:$0xff]   ;;  %v1139_v34 = vld [vmem:[#allocation6 + $0xa8] ss:$12 sps:$4 sm:$0xff]  }
  0x31   :  { %88 = vperm.xlu0 %1107, %v69_v7   ;;  %1011 = vmatprep.subr.bf16.mxu1 %v1120_v17  ;;  %v1137_v32 = vld [vmem:[#allocation6 + $0xac] ss:$12 sps:$4 sm:$0xff]   ;;  %v1140_v33 = vld [vmem:[#allocation6 + $0xb0] ss:$12 sps:$4 sm:$0xff]   ;;  %v151_v50 = vld [vmem:[%s1541_s5] sm:$0x7] }
  0x32   :  { %v163_v52 = vsub.s32 2, %v1421_v48  ;;  %v1431_v53 = vrot.slane %v151_v50, %v155_v49  ;;  %v1435_v54 = vrot.slane %v151_v50, %v159_v51  ;;  %s1462_s12 = smov (!%p939_p2), 0  }
  0x33   :  { %301 = vmatpush1.bf16.msra.mxu0 %v1119_v18  ;;  %1012 = vmatpush3.bf16.msra.mxu1 %v1120_v17 }
  0x34   :  { %97 = vperm.xlu1 %1108, %v72_v14   ;;  %302 = vmatprep.subr.bf16.mxu0 %v1121_v19  ;;  %v164_v55 = vrot.slane %v151_v50, %v163_v52 }
  0x35   :  { %94 = vperm.xlu0 %1107, %v71_v16   ;;  %1013 = vmatprep.subr.bf16.mxu1 %v1124_v20 }
  0x37   :  { %303 = vmatpush1.bf16.msra.mxu0 %v1123_v22  ;;  %1014 = vmatpush3.bf16.msra.mxu1 %v1124_v20 }
  0x38   :  { %304 = vmatprep.subr.bf16.mxu0 %v1125_v23  ;;  %1015 = vmatprep.subr.bf16.mxu1 %v1128_v24 }
  0x39   :  { %461 = vperm.xlu0 %1107, %v459_v21  }
  0x3b   :  { %305 = vmatpush1.bf16.msra.mxu0 %v1127_v25  ;;  %1016 = vmatpush3.bf16.msra.mxu1 %v1128_v24 }
  0x3c   :  { %306 = vmatprep.subr.bf16.mxu0 %v1129_v26  ;;  %1017 = vmatprep.subr.bf16.mxu1 %v1132_v27 }
  0x3f   :  { %307 = vmatpush1.bf16.msra.mxu0 %v1131_v28  ;;  %1018 = vmatpush3.bf16.msra.mxu1 %v1132_v27 }
  0x40   :  { %308 = vmatprep.subr.bf16.mxu0 %v1133_v29  ;;  %1019 = vmatprep.subr.bf16.mxu1 %v1136_v30 }
  0x43   :  { %309 = vmatpush1.bf16.msra.mxu0 %v1135_v31  ;;  %1020 = vmatpush3.bf16.msra.mxu1 %v1136_v30 }
  0x44   :  { %310 = vmatprep.subr.bf16.mxu0 %v1137_v32  ;;  %1021 = vmatprep.subr.bf16.mxu1 %v1140_v33 }
  0x47   :  { %311 = vmatpush1.bf16.msra.mxu0 %v1139_v34  ;;  %1022 = vmatpush3.bf16.msra.mxu1 %v1140_v33 }
  0xa7   :  { %v83_v36 = vpop.permute.xlu1 %82 }
  0xa8   :  { %v77_v37 = vpop.permute.xlu0 %76  ;;  %vm101_vm0 = vcmp.eq.s32.totalorder %v74_v38, %v83_v36 }
  0xa9   :  { %vm99_vm3 = vcmp.eq.s32.totalorder %v74_v38, %v77_v37 }
  0xab   :  { %v86_v39 = vpop.permute.xlu1 %85 }
  0xac   :  { %v80_v40 = vpop.permute.xlu0 %79  ;;  %vm102_vm1 = vcmp.eq.s32.totalorder %v74_v38, %v86_v39 }
  0xad   :  { %vm100_vm2 = vcmp.eq.s32.totalorder %v74_v38, %v80_v40  ;;  %vm1408_vm4 = vmpackc.low %vm102_vm1, %vm101_vm0 }
  0xae   :  { %vm923_vm5 = vmpackc.low %vm100_vm2, %vm99_vm3 }
  0xaf   :  { %924 = vmatmul.mubr.msk.bf16.vlgmr.msra.gmra.mrb[0].mxu0 %vm923_vm5, %v1292_v42  ;;  %1023 = vmatprep.mubr.msk.bf16.mxu1 %vm923_vm5, %v1292_v42  ;;  %v92_v43 = vpop.permute.xlu1 %91 }
  0xb0   :  { %v89_v44 = vpop.permute.xlu0 %88  ;;  %vm104_vm6 = vcmp.eq.s32.totalorder %v74_v38, %v92_v43  ;;  %1024 = vmatmul.mubr.msk.bf16.vlgmr.msra.gmra.mrb[0].mxu1 %vm1408_vm4, %v1292_v42  ;;  %338 = vmatprep.mubr.bf16.mxu0 %v1291_v0 }
  0xb1   :  { %vm103_vm7 = vcmp.eq.s32.totalorder %v74_v38, %v89_v44 }
  0xb2   :  { %vm927_vm8 = vmpackc.low %vm104_vm6, %vm103_vm7 }
  0xb3   :  { %1027 = vmatprep.mubr.msk.bf16.mxu1 %vm927_vm8, %v1292_v42  ;;  %v98_v45 = vpop.permute.xlu1 %97 }
  0xb4   :  { %v95_v46 = vpop.permute.xlu0 %94  ;;  %vm106_vm9 = vcmp.eq.s32.totalorder %v74_v38, %v98_v45 }
  0xb5   :  { %vm105_vm10 = vcmp.eq.s32.totalorder %v74_v38, %v95_v46 }
  0xb6   :  { %vm929_vm11 = vmpackc.low %vm106_vm9, %vm105_vm10 }
  0xb7   :  { %926 = vmatmul.mubr.msk.bf16.gmra.mrb[4].mxu0 %vm1408_vm4, %v1292_v42 }
  0xb8   :  { %v1417_v47 = vpop.permute.xlu0 %461  ;;  %1028 = vmatmul.mubr.msk.bf16.gmra.mrb[4].mxu1 %vm929_vm11, %v1292_v42  ;;  %348 = vmatprep.mubr.bf16.mxu0 %v1291_v0 }
  0xbf   :  { %928 = vmatmul.mubr.msk.bf16.gmra.mrb[8].mxu0 %vm927_vm8, %v1292_v42 }
  0xc0   :  { %358 = vmatprep.mubr.bf16.mxu0 %v1291_v0 }
  0xc7   :  { %930 = vmatmul.mubr.msk.bf16.gmra.mrb[12].mxu0 %vm929_vm11, %v1292_v42  ;;  %v1460_v42 = vmov (!%p939_p2), 0.0  }
 0x182   :  { %v330_v56 = vpop.f32.mrb[0].mxu0 }
 0x183   :  { %v331_v57 = vadd.f32 %v330_v56, %v1431_v53  ;;  %v332_v58 = vpop.f32.mrb[1].mxu0  ;;  %v1025_v59 = vpop.f32.mrb[0].mxu1 }
 0x184   :  { %v333_v60 = vadd.f32 %v332_v58, %v1435_v54  ;;  %v412_v61 = vadd.f32 %v1025_v59, %v164_v55  ;;  %v334_v62 = vpop.f32.mrb[2].mxu0  ;;  %v403_v63 = vpop.f32.mrb[1].mxu1 }
 0x185   :  { %434 = vst [vmem:[#allocation2] sm:$0xff] %v331_v57  ;;  %v335_v0 = vadd.f32 %v334_v62, %v1431_v53  ;;  %v404_v2 = vadd.f32 %v403_v63, %v164_v55  ;;  %v336_v3 = vpop.f32.mrb[3].mxu0  ;;  %v1026_v4 = vpop.f32.mrb[2].mxu1 }
 0x186   :  { %435 = vst [vmem:[#allocation2 + $0x8] sm:$0xff] %v333_v60  ;;  %442 = vst [vmem:[#allocation2 + $0x40] sm:$0xff] %v412_v61  ;;  %v337_v5 = vadd.f32 %v336_v3, %v1435_v54  ;;  %v415_v6 = vadd.f32 %v1026_v4, %v164_v55  ;;  %v406_v7 = vpop.f32.mrb[3].mxu1 }
 0x187   :  { %437 = vst [vmem:[#allocation2 + $0x18] sm:$0xff] %v335_v0  ;;  %436 = vst [vmem:[#allocation2 + $0x10] sm:$0xff] %v404_v2  ;;  %v407_v8 = vadd.f32 %v406_v7, %v164_v55 }
 0x188   :  { %438 = vst [vmem:[#allocation2 + $0x20] sm:$0xff] %v337_v5  ;;  %445 = vst [vmem:[#allocation2 + $0x58] sm:$0xff] %v415_v6 }
 0x189   :  { %439 = vst [vmem:[#allocation2 + $0x28] sm:$0xff] %v407_v8 }
 0x18a   :  { %v340_v9 = vpop.f32.mrb[4].mxu0 }
 0x18b   :  { %v341_v10 = vadd.f32 %v340_v9, %v1431_v53  ;;  %v342_v11 = vpop.f32.mrb[5].mxu0  ;;  %v1029_v12 = vpop.f32.mrb[4].mxu1 }
 0x18c   :  { %v343_v13 = vadd.f32 %v342_v11, %v1435_v54  ;;  %v428_v14 = vadd.f32 %v1029_v12, %v164_v55  ;;  %v344_v15 = vpop.f32.mrb[6].mxu0  ;;  %v419_v16 = vpop.f32.mrb[5].mxu1 }
 0x18d   :  { %440 = vst [vmem:[#allocation2 + $0x30] sm:$0xff] %v341_v10  ;;  %v345_v17 = vadd.f32 %v344_v15, %v1431_v53  ;;  %v420_v18 = vadd.f32 %v419_v16, %v164_v55  ;;  %v346_v19 = vpop.f32.mrb[7].mxu0  ;;  %v1030_v20 = vpop.f32.mrb[6].mxu1 }
 0x18e   :  { %441 = vst [vmem:[#allocation2 + $0x38] sm:$0xff] %v343_v13  ;;  %454 = vst [vmem:[#allocation2 + $0xa0] sm:$0xff] %v428_v14  ;;  %v347_v21 = vadd.f32 %v346_v19, %v1435_v54  ;;  %v431_v22 = vadd.f32 %v1030_v20, %v164_v55  ;;  %v422_v23 = vpop.f32.mrb[7].mxu1 }
 0x18f   :  { %443 = vst [vmem:[#allocation2 + $0x48] sm:$0xff] %v345_v17  ;;  %448 = vst [vmem:[#allocation2 + $0x70] sm:$0xff] %v420_v18  ;;  %v423_v24 = vadd.f32 %v422_v23, %v164_v55 }
 0x190   :  { %444 = vst [vmem:[#allocation2 + $0x50] sm:$0xff] %v347_v21  ;;  %457 = vst [vmem:[#allocation2 + $0xb8] sm:$0xff] %v431_v22 }
 0x191   :  { %451 = vst [vmem:[#allocation2 + $0x88] sm:$0xff] %v423_v24 }
 0x192   :  { %v350_v25 = vpop.f32.mrb[8].mxu0 }
 0x193   :  { %v351_v26 = vadd.f32 %v350_v25, %v1431_v53  ;;  %v352_v27 = vpop.f32.mrb[9].mxu0 }
 0x194   :  { %v353_v28 = vadd.f32 %v352_v27, %v1435_v54  ;;  %v354_v29 = vpop.f32.mrb[10].mxu0 }
 0x195   :  { %446 = vst [vmem:[#allocation2 + $0x60] sm:$0xff] %v351_v26  ;;  %v355_v30 = vadd.f32 %v354_v29, %v1431_v53  ;;  %v356_v31 = vpop.f32.mrb[11].mxu0 }
 0x196   :  { %447 = vst [vmem:[#allocation2 + $0x68] sm:$0xff] %v353_v28  ;;  %v357_v32 = vadd.f32 %v356_v31, %v1435_v54 }
 0x197   :  { %449 = vst [vmem:[#allocation2 + $0x78] sm:$0xff] %v355_v30 }
 0x198   :  { %450 = vst [vmem:[#allocation2 + $0x80] sm:$0xff] %v357_v32 }
 0x19a   :  { %v360_v33 = vpop.f32.mrb[12].mxu0  ;;  %894 = sbr.rel (%p939_p2) target bundleno = 716 (0x2cc), region = 66 }
 0x19b   :  { %v361_v34 = vadd.f32 %v360_v33, %v1431_v53  ;;  %v362_v35 = vpop.f32.mrb[13].mxu0 }
 0x19c   :  { %v363_v36 = vadd.f32 %v362_v35, %v1435_v54  ;;  %v364_v37 = vpop.f32.mrb[14].mxu0 }
 0x19d   :  { %452 = vst [vmem:[#allocation2 + $0x90] sm:$0xff] %v361_v34  ;;  %v365_v38 = vadd.f32 %v364_v37, %v1431_v53  ;;  %v366_v39 = vpop.f32.mrb[15].mxu0 }
 0x19e   :  { %453 = vst [vmem:[#allocation2 + $0x98] sm:$0xff] %v363_v36  ;;  %v367_v40 = vadd.f32 %v366_v39, %v1435_v54 }
 0x19f   :  { %455 = vst [vmem:[#allocation2 + $0xa8] sm:$0xff] %v365_v38 }
 0x1a0   :  { %456 = vst [vmem:[#allocation2 + $0xb0] sm:$0xff] %v367_v40 }
 0x1a1 LB: > { %v1141_v43 = vld [vmem:[#allocation9 + $0x4] ss:$12 sps:$4 sm:$0xff]   ;;  %v1143_v44 = vld [vmem:[#allocation9] ss:$12 sps:$4 sm:$0xff]   ;;  %v1293_v45 = vmov 0.0   ;;  %v1294_v46 = vmov 0   ;;  %v477_v9 = vpack.c.bf16 %v1277_v42, %v1277_v42  ;;  %v514_v12 = vrot.slane %v1379_v1, %v155_v49  ;;  %s1281_s12 = sphi %s1462_s12, %s467_s12   ;;  %v1277_v42 = vphi %v1460_v42, %v1548_v42  }
 0x1a2   : > { %1031 = vmatprep.subr.bf16.mxu1 %v1293_v45  ;;  %686 = vmatprep.mubr.bf16.mxu0 %v1294_v46  ;;  %v1144_v50 = vld [vmem:[#allocation9 + $0x1c] ss:$12 sps:$4 sm:$0xff]   ;;  %vm1295_vm12 = vmmov 0   ;;  %v1146_v53 = vld [vmem:[#allocation9 + $0x18] ss:$12 sps:$4 sm:$0xff]   ;;  %s976_s3 = smul.u32 24, %s1281_s12  ;;  %v518_v19 = vrot.slane %v1379_v1, %v159_v51  ;;  %v522_v32 = vrot.slane %v1379_v1, %v163_v52  ;;  %v755_v41 = vstv %s1281_s12 }
 0x1a3   : > { %654 = vmatprep.subr.bf16.mxu0 %v1141_v43  ;;  %1047 = vmatprep.mubr.msk.bf16.mxu1 %vm1295_vm12, %v1293_v45  ;;  %v1147_v54 = vld [vmem:[#allocation9 + $0x34] ss:$12 sps:$4 sm:$0xff]   ;;  %v1149_v55 = vld [vmem:[#allocation9 + $0x30] ss:$12 sps:$4 sm:$0xff]   ;;  %v1150_v56 = vld [vmem:[#allocation9 + $0x4c] ss:$12 sps:$4 sm:$0xff]   ;;  %vm756_vm13 = vcmp.lt.s32.totalorder %v755_v41, %v1417_v47 }
 0x1a4   : > { %655 = vmatpush1.bf16.msra.mxu0 %v1143_v44  ;;  %v1162_v57 = vld [vmem:[#allocation9 + $0x8] ss:$12 sps:$4 sm:$0xff]   ;;  %v1153_v59 = vld [vmem:[#allocation9 + $0x64] ss:$12 sps:$4 sm:$0xff]   ;;  %v1166_v60 = vld [vmem:[#allocation9 + $0x20] ss:$12 sps:$4 sm:$0xff]  }
 0x1a5   : > { %656 = vmatprep.subr.bf16.mxu0 %v1144_v50  ;;  %v1152_v58 = vld [vmem:[#allocation9 + $0x48] ss:$12 sps:$4 sm:$0xff]   ;;  %1032 = vmatpush3.bf16.msra.mxu1 %v1162_v57  ;;  %v1155_v61 = vld [vmem:[#allocation9 + $0x60] ss:$12 sps:$4 sm:$0xff]   ;;  %v1167_v63 = vld [vmem:[#allocation9 + $0x38] ss:$12 sps:$4 sm:$0xff]  }
 0x1a6   : > { %1033 = vmatprep.subr.bf16.mxu1 %v1293_v45  ;;  %v1156_v62 = vld [vmem:[#allocation9 + $0x7c] ss:$12 sps:$4 sm:$0xff]   ;;  %v1158_v0 = vld [vmem:[#allocation9 + $0x78] ss:$12 sps:$4 sm:$0xff]   ;;  %v1159_v2 = vld [vmem:[#allocation9 + $0x94] ss:$12 sps:$4 sm:$0xff]  }
 0x1a7   : > { %v1168_v3 = vld [vmem:[#allocation9 + $0x50] ss:$12 sps:$4 sm:$0xff]   ;;  %v1163_v5 = vld [vmem:[#allocation9 + $0xac] ss:$12 sps:$4 sm:$0xff]   ;;  %v1169_v6 = vld [vmem:[#allocation9 + $0x68] ss:$12 sps:$4 sm:$0xff]  }
 0x1a8   : > { %657 = vmatpush1.bf16.msra.mxu0 %v1146_v53  ;;  %v1161_v4 = vld [vmem:[#allocation9 + $0x90] ss:$12 sps:$4 sm:$0xff]   ;;  %v1165_v7 = vld [vmem:[#allocation9 + $0xa8] ss:$12 sps:$4 sm:$0xff]   ;;  %v1170_v8 = vld [vmem:[#allocation9 + $0x80] ss:$12 sps:$4 sm:$0xff]  }
 0x1a9   : > { %658 = vmatprep.subr.bf16.mxu0 %v1147_v54  ;;  %1034 = vmatpush3.bf16.msra.mxu1 %v1166_v60  ;;  %v1171_v10 = vld [vmem:[#allocation9 + $0x98] ss:$12 sps:$4 sm:$0xff]   ;;  %v1172_v11 = vld [vmem:[#allocation9 + $0xb0] ss:$12 sps:$4 sm:$0xff]   ;;  %s473_s10 = scalar_lea.vmem [#allocation2], %s976_s3  ;;  %s467_s12 = sadd.s32 1, %s1281_s12  }
 0x1aa   : > { %1035 = vmatprep.subr.bf16.mxu1 %v1293_v45  ;;  %v474_v13 = vld [vmem:[%s473_s10] sm:$0xff]  ;;  %v475_v23 = vld [vmem:[%s473_s10 + $0x8] sm:$0xff]  ;;  %v476_v36 = vld [vmem:[%s473_s10 + $0x10] sm:$0xff]  ;;  %p466_p3 = scmp.ge.s32.totalorder %s467_s12, %s1536_s0 }
 0x1ac   : > { %659 = vmatpush1.bf16.msra.mxu0 %v1149_v55 }
 0x1ad   : > { %660 = vmatprep.subr.bf16.mxu0 %v1150_v56  ;;  %1036 = vmatpush3.bf16.msra.mxu1 %v1167_v63 }
 0x1ae   : > { %1037 = vmatprep.subr.bf16.mxu1 %v1293_v45 }
 0x1b0   : > { %661 = vmatpush1.bf16.msra.mxu0 %v1152_v58 }
 0x1b1   : > { %662 = vmatprep.subr.bf16.mxu0 %v1153_v59  ;;  %1038 = vmatpush3.bf16.msra.mxu1 %v1168_v3 }
 0x1b2   : > { %1039 = vmatprep.subr.bf16.mxu1 %v1293_v45 }
 0x1b4   : > { %663 = vmatpush1.bf16.msra.mxu0 %v1155_v61 }
 0x1b5   : > { %664 = vmatprep.subr.bf16.mxu0 %v1156_v62  ;;  %1040 = vmatpush3.bf16.msra.mxu1 %v1169_v6 }
 0x1b6   : > { %1041 = vmatprep.subr.bf16.mxu1 %v1293_v45 }
 0x1b8   : > { %665 = vmatpush1.bf16.msra.mxu0 %v1158_v0 }
 0x1b9   : > { %666 = vmatprep.subr.bf16.mxu0 %v1159_v2  ;;  %1042 = vmatpush3.bf16.msra.mxu1 %v1170_v8 }
 0x1ba   : > { %1043 = vmatprep.subr.bf16.mxu1 %v1293_v45 }
 0x1bc   : > { %667 = vmatpush1.bf16.msra.mxu0 %v1161_v4 }
 0x1bd   : > { %668 = vmatprep.subr.bf16.mxu0 %v1163_v5  ;;  %1044 = vmatpush3.bf16.msra.mxu1 %v1171_v10 }
 0x1be   : > { %1045 = vmatprep.subr.bf16.mxu1 %v1293_v45 }
 0x1c0   : > { %669 = vmatpush1.bf16.msra.mxu0 %v1165_v7 }
 0x1c1   : > { %1046 = vmatpush3.bf16.msra.mxu1 %v1172_v11 }
 0x1c3   : > { %687 = vmatmul.mubr.bf16.vlgmr.msra.gmra.mrb[0].mxu0 %v477_v9 }
 0x1c4   : > { %1048 = vmatmul.mubr.bf16.vlgmr.msra.gmra.mrb[0].mxu1 %v477_v9 }
 0x296   : > { %v688_v14 = vpop.f32.mrb[0].mxu0 }
 0x297   : > { %v689_v15 = vadd.f32 %v688_v14, %v514_v12  ;;  %v690_v16 = vpop.f32.mrb[1].mxu0  ;;  %v729_v24 = vpop.f32.mrb[0].mxu1 }
 0x298   : > { %v692_v17 = vpop.f32.mrb[2].mxu0  ;;  %v691_v22 = vadd.f32 %v690_v16, %v518_v19  ;;  %v1049_v25 = vpop.f32.mrb[1].mxu1  ;;  %v730_v33 = vadd.f32 %v729_v24, %v522_v32 }
 0x299   : > { %v735_v18 = vadd.f32 %v689_v15, %v474_v13  ;;  %v693_v20 = vpop.f32.mrb[3].mxu0  ;;  %v732_v27 = vpop.f32.mrb[2].mxu1 }
 0x29a   : > { %v742_v26 = vadd.f32 %v691_v22, %v475_v23  ;;  %v1050_v28 = vpop.f32.mrb[3].mxu1 }
 0x29b   : > { %v965_v21 = vmul.f32 -1.442695, %v735_v18 }
 0x29c   : > { %v966_v29 = vmul.f32 -1.442695, %v742_v26 }
 0x29d   : > { %1173 = vpow2.f32 %v965_v21 }
 0x29e   : > { %1175 = vpow2.f32 %v966_v29 }
 0x2a7   : > { %v1174_v30 = vpop.eup %1173 }
 0x2a8   : > { %v739_v31 = vadd.f32 1.0, %v1174_v30  ;;  %v1176_v34 = vpop.eup %1175 }
 0x2a9   : > { %v746_v38 = vadd.f32 1.0, %v1176_v34 }
 0x2aa   : > { %1177 = vrcp.f32 %v739_v31 }
 0x2b4   : > { %v1178_v35 = vpop.eup %1177 }
 0x2b5   : > { %v749_v37 = vmul.f32 %v1178_v35, %v730_v33 }
 0x2b7   : > { %v750_v39 = vadd.f32 %v749_v37, %v476_v36 }
 0x2b9   : > { %1179 = vtanh.f32 %v750_v39 }
 0x2ba   : > { %1181 = vrcp.f32 %v746_v38 }
 0x2c3   : > { %v1180_v40 = vpop.eup %1179 }
 0x2c4   : > { %v752_v43 = vsub.f32 %v1277_v42, %v1180_v40  ;;  %v1182_v44 = vpop.eup %1181 }
 0x2c5   :  { %469 = sbr.rel (!%p466_p3) target bundleno = 417 (0x1a1), region = 72 }
 0x2c6   : > { %v753_v45 = vmul.f32 %v1182_v44, %v752_v43 }
 0x2c8   : > { %v754_v46 = vadd.f32 %v1180_v40, %v753_v45 }
 0x2ca   : > { %v757_v50 = vsel %vm756_vm13, %v754_v46, %v1277_v42  }
 0x2cb   : > { %v1548_v42 = vmov %v757_v50  ;;  %v1549_v41 = vmov (%p466_p3), %v757_v50 }
 0x2cc PF:  { %v1183_v42 = vld [vmem:[%s1543_s7] sm:$0xff]   ;;  %v1296_v53 = vmov 0.0   ;;  %v1184_v54 = vld [vmem:[%s1543_s7 + $0x8] sm:$0xff]   ;;  %vm1297_vm14 = vmmov 0   ;;  %v1185_v1 = vld [vmem:[%s1543_s7 + $0x10] sm:$0xff]   ;;  %v760_v55 = vpack.c.bf16 %v1285_v41, %v1285_v41  ;;  %s1298_s30 = smov [#allocation11]   ;;  %v1285_v41 = vphi %v1458_v41, %v1549_v41  }
 0x2cd   :  { %1051 = vmatprep.subr.bf16.mxu0 %v1296_v53  ;;  %1067 = vmatprep.mubr.msk.bf16.mxu0 %vm1297_vm14, %v1296_v53  ;;  %v1186_v47 = vld [vmem:[%s1543_s7 + $0x18] sm:$0xff]   ;;  %v1187_v48 = vld [vmem:[%s1543_s7 + $0x20] sm:$0xff]   ;;  %v1188_v49 = vld [vmem:[%s1543_s7 + $0x28] sm:$0xff]   ;;  %s879_s1 = sshll.u32 %s1298_s30, 4  ;;  %s880_s1 = int_to_ptr.vmem [resolvable:$true] %s879_s1 }
 0x2ce   :  { %1052 = vmatpush3.bf16.msra.mxu0 %v1183_v42  ;;  %v1189_v51 = vld [vmem:[%s1543_s7 + $0x30] sm:$0xff]   ;;  %v1190_v52 = vld [vmem:[%s1543_s7 + $0x38] sm:$0xff]   ;;  %v967_v56 = vld [vmem:[%s1544_s8] ss:$0 sm:$0xff]  ;;  %s1235_s2 = scalar_lea.vmem %s880_s1, 128  ;;  %p1240_p5 = scmp.lt.s32.totalorder %s880_s1, %s880_s1 }
 0x2cf   :  { %1053 = vmatprep.subr.bf16.mxu0 %v1296_v53  ;;  %p1236_p4 = scmp.ne.s32.totalorder %s880_s1, %s1235_s2  ;;  %p1241_p6 = scmp.lt.s32.totalorder %s1235_s2, %s1235_s2 }
 0x2d1   :  { %p1242_p7 = por %p1241_p6, %p1240_p5 }
 0x2d2   :  { %1054 = vmatpush3.bf16.msra.mxu0 %v1184_v54 }
 0x2d3   :  { %1055 = vmatprep.subr.bf16.mxu0 %v1296_v53  ;;  %p1243_p8 = pnand %p1242_p7, %p1236_p4 }
 0x2d6   :  { %1056 = vmatpush3.bf16.msra.mxu0 %v1185_v1 }
 0x2d7   :  { %1057 = vmatprep.subr.bf16.mxu0 %v1296_v53 }
 0x2da   :  { %1058 = vmatpush3.bf16.msra.mxu0 %v1186_v47 }
 0x2db   :  { %1059 = vmatprep.subr.bf16.mxu0 %v1296_v53 }
 0x2de   :  { %1060 = vmatpush3.bf16.msra.mxu0 %v1187_v48 }
 0x2df   :  { %1061 = vmatprep.subr.bf16.mxu0 %v1296_v53 }
 0x2e2   :  { %1062 = vmatpush3.bf16.msra.mxu0 %v1188_v49 }
 0x2e3   :  { %1063 = vmatprep.subr.bf16.mxu0 %v1296_v53 }
 0x2e6   :  { %1064 = vmatpush3.bf16.msra.mxu0 %v1189_v51 }
 0x2e7   :  { %1065 = vmatprep.subr.bf16.mxu0 %v1296_v53 }
 0x2ea   :  { %1066 = vmatpush3.bf16.msra.mxu0 %v1190_v52 }
 0x2ed   :  { %1068 = vmatmul.mubr.bf16.vlgmr.msra.gmra.mrb[0].mxu0 %v760_v55 }
 0x3c0   :  { %v866_v57 = vpop.f32.mrb[0].mxu0 }
 0x3c1   :  { %v867_v58 = vadd.f32 %v967_v56, %v866_v57  ;;  %v1069_v59 = vpop.f32.mrb[1].mxu0 }
 0x3c2   :  { %v869_v60 = vpop.f32.mrb[2].mxu0 }
 0x3c3   :  { %872 = vst [vmem:[#allocation11] sm:$0xff] %v867_v58  ;;  %v1070_v61 = vpop.f32.mrb[3].mxu0 }
 0x3c4   :  { %1246 = shalt.err (!%p1243_p8)
}
 0x3c5   :  { %s1247_s8 = scalar_lea.hbm %s1545_s9, 128 }
 0x3c6   :  { %p1248_p9 = scmp.ne.s32.totalorder %s1545_s9, %s1247_s8  ;;  %p1251_p10 = scmp.lt.u32.totalorder %s1247_s8, %s1545_s9 }
 0x3c8   :  { %p1253_p11 = pnand %p1251_p10, %p1248_p9 }
 0x3ca   :  { %1256 = shalt.err (!%p1253_p11)
}
 0x3cb   :  { %882 = dma.vmem_to_hbm [thread:$0]  %s880_s1, 128, %s1545_s9, [#allocation8]  }
 0x3cc   :  { %1273 = dma.done.wait [#allocation8], 128  }
 0x3cd   :  { %1274 = vsyncadd [#allocation8], 4294967168 }
 0x3ce   :  { %886 = vsyncpa [#allocation7], 1 }
 0x3cf   :  { %887 = vsyncpa [#allocation10], 1 }
 0x3d0   :  { %888 = vsyncpa [#allocation8], 1 }

</bundles_post_ra>
